<compile_context>
chip_gen: v6e
topology: v6e:2x2x1
jax: 0.10.0
libtpu: 0.0.40
codegen_flags: <defaults>
</compile_context>

<pallas_src>
import jax
import jax.numpy as jnp
from jax.experimental import pallas as pl
from jax.experimental.pallas import tpu as pltpu

# ---------------- model dims ----------------
D = 32            # hidden_size
FF = 4 * D        # FeaturesProjector intermediate size
VOCAB = 64
CLASS_TOKEN_INDEX = 3
EPS = 1e-8
LOGIT_SCALE_INIT = 2.6592  # config.logit_scale_init_value
LANE = 128


def _round_up(n, m):
    return ((n + m - 1) // m) * m


# ---------------- fused Pallas kernel ----------------
def gliclass_fused_kernel(
        cpos_ref, ncls_ref,                                    # scalar prefetch (SMEM)
        tok_ref, enc_w_ref, enc_b_ref,                         # encoder stub
        tw1_ref, tb1_ref, tw2_ref, tb2_ref,                    # text_projector
        cw1_ref, cb1_ref, cw2_ref, cb2_ref,                    # classes_projector
        scale_ref,                                             # logit_scale (SMEM)
        logits_ref, text_ref, cls_ref,                         # lane-padded outputs
        h_scr):                                                # VMEM scratch (B*S, D)
    B, C = cpos_ref.shape
    BS, _ = tok_ref.shape
    S = BS // B

    # 1) encoder stub: per-token dense + tanh over the whole sequence.
    # TODO(synk): the HF transformer backbone (encoder_model) has no clean single-kernel
    # equivalent; it is replaced by this synthetic dense+tanh layer over token embeddings.
    h = jnp.tanh(jnp.dot(tok_ref[...], enc_w_ref[...],
                         preferred_element_type=jnp.float32) + enc_b_ref[...])
    h_scr[...] = h                                             # VMEM-resident encoder output

    # 2) pooler: pooling_strategy='first' (extract_text_features=False) -> token 0 / seq.
    pooled = jnp.concatenate([h[b * S:b * S + 1, :] for b in range(B)], axis=0)  # (B, D)

    # 3) class-token gather: SMEM-prefetched positions -> dynamic row loads from VMEM.
    #    Padded slots (c >= num_class_tokens[b]) are zeroed, matching the PyTorch scatter.
    rows = []
    for b in range(B):
        for c in range(C):
            pos = cpos_ref[b, c]
            valid = (c < ncls_ref[b]).astype(jnp.float32)
            rows.append(h_scr[pl.ds(b * S + pos, 1), :] * valid)
    classes = jnp.concatenate(rows, axis=0)                    # (B*C, D)

    # 4) FeaturesProjector MLPs (both inside this kernel; dropout = identity in eval).
    def mlp(x, w1, b1, w2, b2):
        hh = jnp.maximum(
            jnp.dot(x, w1[...], preferred_element_type=jnp.float32) + b1[...], 0.0)
        return jnp.dot(hh, w2[...], preferred_element_type=jnp.float32) + b2[...]

    tproj = mlp(pooled, tw1_ref, tb1_ref, tw2_ref, tb2_ref)    # (B, D)
    cproj = mlp(classes, cw1_ref, cb1_ref, cw2_ref, cb2_ref)   # (B*C, D)

    # 5) normalize_features: x / (||x||_2 + eps), exactly as the PyTorch module.
    #    (Per-row sqrt/div is O(rows), not the hot path; rsqrt(ss+eps^2) would move it to
    #     the EUP at the cost of an eps-level semantic deviation, so exact form is kept.)
    def l2norm(x):
        ss = jnp.sum(x * x, axis=-1, keepdims=True)
        return x / (jnp.sqrt(ss) + EPS)

    p_n = l2norm(tproj)
    c_n = l2norm(cproj)

    # 6) dot scorer on the MXU + logit_scale from SMEM. Unrolled over the tiny static
    #    batch; at realistic batch sizes use jnp.einsum('bd,bcd->bc', ...).
    scale = scale_ref[0]
    logit_rows = []
    for b in range(B):
        pb = p_n[b:b + 1, :]                                   # (1, D)
        cb = c_n[b * C:(b + 1) * C, :]                         # (C, D)
        logit_rows.append(
            jax.lax.dot_general(pb, cb, (((1,), (1,)), ((), ())),
                                preferred_element_type=jnp.float32))   # (1, C)
    logits = jnp.concatenate(logit_rows, axis=0) * scale       # (B, C)
    # NOTE: padded class slots still get (bias-driven) scores like the original module;
    # downstream must mask with classes_embedding_mask.

    # 7) lane-dense stores: pad last dim to a multiple of 128; wrapper slices it back.
    def pad_lanes(x, width):
        extra = width - x.shape[-1]
        if extra == 0:
            return x
        return jnp.concatenate(
            [x, jnp.zeros(x.shape[:-1] + (extra,), x.dtype)], axis=-1)

    logits_ref[...] = pad_lanes(logits, logits_ref.shape[-1])
    text_ref[...] = pad_lanes(p_n, text_ref.shape[-1])
    cls_ref[...] = pad_lanes(c_n, cls_ref.shape[-1])


# ---------------- pallas_call wrapper ----------------
def _vspec(shape):
    n = len(shape)
    # index_map receives (grid idx, *scalar_prefetch_refs); full-array block -> zeros.
    return pl.BlockSpec(shape, lambda *args, _n=n: (0,) * _n)


def _fused_call(class_pos, num_class, tok2d, params, B, S, C):
    CPAD = _round_up(C, LANE)
    DPAD = _round_up(D, LANE)
    tp, cp = params['text_proj'], params['class_proj']
    grid_spec = pltpu.PrefetchScalarGridSpec(
        num_scalar_prefetch=2,                                 # class_pos, num_class
        grid=(1,),
        in_specs=[
            _vspec((B * S, D)),                                # token embeddings
            _vspec((D, D)), _vspec((1, D)),                    # encoder stub
            _vspec((D, FF)), _vspec((1, FF)), _vspec((FF, D)), _vspec((1, D)),   # text proj
            _vspec((D, FF)), _vspec((1, FF)), _vspec((FF, D)), _vspec((1, D)),   # class proj
            pl.BlockSpec(memory_space=pltpu.MemorySpace.SMEM),                   # logit_scale
        ],
        out_specs=(
            _vspec((B, CPAD)),
            _vspec((B, DPAD)),
            _vspec((B * C, DPAD)),
        ),
        scratch_shapes=[pltpu.VMEM((B * S, D), jnp.float32)],
    )
    return pl.pallas_call(
        gliclass_fused_kernel,
        out_shape=(
            jax.ShapeDtypeStruct((B, CPAD), jnp.float32),       # logits (lane-padded)
            jax.ShapeDtypeStruct((B, DPAD), jnp.float32),       # normalized text embeds
            jax.ShapeDtypeStruct((B * C, DPAD), jnp.float32),   # normalized class embeds
        ),
        grid_spec=grid_spec,
        compiler_params=pltpu.CompilerParams(
            dimension_semantics=("arbitrary",)),
    )(class_pos, num_class, tok2d,
      params['enc_w'], params['enc_b'],
      tp['w1'], tp['b1'], tp['w2'], tp['b2'],
      cp['w1'], cp['b1'], cp['w2'], cp['b2'],
      params['logit_scale'])


# ---------------- forward (jit-compatible) ----------------
def gliclass_uni_encoder_forward(params, input_ids, attention_mask, *, max_num_classes):
    """`max_num_classes` replaces the PyTorch module's dynamic num_class_tokens.max()
    (statically known by whoever built the prompt), removing the host sync."""
    B, S = input_ids.shape
    C = max_num_classes

    # encoder_model input embeddings (tiny XLA gather).
    tok2d = params['embedding'][input_ids].reshape(B * S, D)

    # class-token bookkeeping: tiny int ops, stays in-graph (no device_get).
    class_mask = input_ids == CLASS_TOKEN_INDEX                                # (B, S)
    num_class = jnp.sum(class_mask, axis=-1).astype(jnp.int32)                 # (B,)
    ordinal = jnp.cumsum(class_mask, axis=-1) - 1                              # (B, S)
    sel = class_mask[:, None, :] & (ordinal[:, None, :] ==
                                    jnp.arange(C)[None, :, None])              # (B, C, S)
    class_pos = jnp.argmax(sel.astype(jnp.int32), axis=-1).astype(jnp.int32)   # (B, C)
    classes_embedding_mask = (jnp.arange(C)[None, :] < num_class[:, None]
                              ).astype(attention_mask.dtype)                   # (B, C)

    logits_pad, text_pad, cls_pad = _fused_call(
        class_pos, num_class, tok2d, params, B, S, C)

    logits = logits_pad[:, :C]
    text_embeddings = text_pad[:, :D]
    class_embeddings = cls_pad[:, :D].reshape(B, C, D)

    # TODO(synk): get_loss (CE / focal / contrastive branches) not translated; labels=None.
    return {
        'loss': None,
        'logits': logits,
        'text_embeddings': text_embeddings,
        'class_embeddings': class_embeddings,
        'classes_embedding_mask': classes_embedding_mask,
    }


# ---------------- params & pure-JAX reference ----------------
def init_params(key):
    ks = jax.random.split(key, 8)

    def lin(k, fan_in, fan_out):
        return jax.random.normal(k, (fan_in, fan_out), jnp.float32) * 0.02

    return {
        'embedding': jax.random.normal(ks[0], (VOCAB, D), jnp.float32) * 0.02,
        'enc_w': lin(ks[1], D, D),
        'enc_b': jnp.zeros((1, D), jnp.float32),
        'text_proj': {
            'w1': lin(ks[2], D, FF), 'b1': jnp.zeros((1, FF), jnp.float32),
            'w2': lin(ks[3], FF, D), 'b2': jnp.zeros((1, D), jnp.float32),
        },
        'class_proj': {
            'w1': lin(ks[4], D, FF), 'b1': jnp.zeros((1, FF), jnp.float32),
            'w2': lin(ks[5], FF, D), 'b2': jnp.zeros((1, D), jnp.float32),
        },
        'logit_scale': jnp.full((1,), LOGIT_SCALE_INIT, jnp.float32),
    }


def reference_forward(params, input_ids, attention_mask, *, max_num_classes):
    """Pure-JAX reference mirroring the PyTorch module (for correctness checking)."""
    B, S = input_ids.shape
    C = max_num_classes
    tok = params['embedding'][input_ids]
    h = jnp.tanh(tok @ params['enc_w'] + params['enc_b'])
    class_mask = input_ids == CLASS_TOKEN_INDEX
    ordinal = jnp.cumsum(class_mask, axis=-1) - 1
    onehot = (class_mask[:, :, None]
              & (ordinal[:, :, None] == jnp.arange(C)[None, None, :])).astype(h.dtype)
    classes = jnp.einsum('bsc,bsd->bcd', onehot, h)
    pooled = h[:, 0, :]

    def mlp(x, p):
        return jnp.maximum(x @ p['w1'] + p['b1'], 0.0) @ p['w2'] + p['b2']

    tp = mlp(pooled, params['text_proj'])
    cp = mlp(classes, params['class_proj'])
    p_n = tp / (jnp.linalg.norm(tp, axis=-1, keepdims=True) + EPS)
    c_n = cp / (jnp.linalg.norm(cp, axis=-1, keepdims=True) + EPS)
    logits = jnp.einsum('bd,bcd->bc', p_n, c_n) * params['logit_scale'][0]
    return logits, p_n, c_n


# ---------------- demo / smoke test ----------------
if __name__ == "__main__":
    key = jax.random.PRNGKey(0)
    pkey, ikey = jax.random.split(key)
    params = init_params(pkey)

    B, S, C = 2, 16, 3
    input_ids = jax.random.randint(ikey, (B, S), 0, VOCAB, dtype=jnp.int32)
    # make sure random tokens never collide with the class token id ...
    input_ids = jnp.where(input_ids == CLASS_TOKEN_INDEX, CLASS_TOKEN_INDEX + 1, input_ids)
    # ... then place class tokens: row 0 has 3, row 1 has 2 (exercises slot masking).
    input_ids = input_ids.at[0, jnp.array([1, 5, 9])].set(CLASS_TOKEN_INDEX)
    input_ids = input_ids.at[1, jnp.array([2, 6])].set(CLASS_TOKEN_INDEX)
    attention_mask = jnp.ones((B, S), jnp.int32)

    fwd = jax.jit(gliclass_uni_encoder_forward, static_argnames=("max_num_classes",))
    out = fwd(params, input_ids, attention_mask, max_num_classes=C)
    jax.block_until_ready(out['logits'])
    jax.block_until_ready(out['text_embeddings'])
    jax.block_until_ready(out['class_embeddings'])

    assert out['logits'].shape == (B, C)
    assert out['text_embeddings'].shape == (B, D)
    assert out['class_embeddings'].shape == (B, C, D)
    assert out['classes_embedding_mask'].shape == (B, C)

    # Numerical check vs. pure-JAX reference (loose tol: MXU vs XLA f32 dot rounding).
    ref_logits, ref_text, ref_cls = reference_forward(
        params, input_ids, attention_mask, max_num_classes=C)
    assert jnp.allclose(out['logits'], ref_logits, rtol=5e-2, atol=5e-3)
    assert jnp.allclose(out['text_embeddings'], ref_text, rtol=5e-2, atol=5e-3)
    assert jnp.allclose(out['class_embeddings'], ref_cls, rtol=5e-2, atol=5e-3)

    print("KERNEL_OK")
</pallas_src>

<mosaic_0001>
module attributes {stable_mosaic.version = 11 : i64} {
  func.func @gliclass_fused_kernel(%arg0: i32, %arg1: memref<2x3xi32, #tpu.memory_space<smem>>, %arg2: memref<2xi32, #tpu.memory_space<smem>>, %arg3: memref<32x32xf32, #tpu.memory_space<vmem>>, %arg4: memref<32x32xf32, #tpu.memory_space<vmem>>, %arg5: memref<1x32xf32, #tpu.memory_space<vmem>>, %arg6: memref<32x128xf32, #tpu.memory_space<vmem>>, %arg7: memref<1x128xf32, #tpu.memory_space<vmem>>, %arg8: memref<128x32xf32, #tpu.memory_space<vmem>>, %arg9: memref<1x32xf32, #tpu.memory_space<vmem>>, %arg10: memref<32x128xf32, #tpu.memory_space<vmem>>, %arg11: memref<1x128xf32, #tpu.memory_space<vmem>>, %arg12: memref<128x32xf32, #tpu.memory_space<vmem>>, %arg13: memref<1x32xf32, #tpu.memory_space<vmem>>, %arg14: memref<1xf32, #tpu.memory_space<smem>>, %arg15: memref<2x128xf32, #tpu.memory_space<vmem>>, %arg16: memref<2x128xf32, #tpu.memory_space<vmem>>, %arg17: memref<6x128xf32, #tpu.memory_space<vmem>>, %arg18: memref<32x32xf32, #tpu.memory_space<vmem>>) attributes {dimension_semantics = [#tpu.dimension_semantics<arbitrary>], iteration_bounds = array<i64: 1>, scalar_prefetch = 2 : i64, scratch_operands = 1 : i64, tpu.core_type = #tpu.core_type<tc>, window_params = [{pipeline_mode = #tpu.pipeline_mode<synchronous>, transform_indices = @transform_0, window_bounds = array<i64: 32, 32>}, {pipeline_mode = #tpu.pipeline_mode<synchronous>, transform_indices = @transform_1, window_bounds = array<i64: 32, 32>}, {pipeline_mode = #tpu.pipeline_mode<synchronous>, transform_indices = @transform_2, window_bounds = array<i64: 1, 32>}, {pipeline_mode = #tpu.pipeline_mode<synchronous>, transform_indices = @transform_3, window_bounds = array<i64: 32, 128>}, {pipeline_mode = #tpu.pipeline_mode<synchronous>, transform_indices = @transform_4, window_bounds = array<i64: 1, 128>}, {pipeline_mode = #tpu.pipeline_mode<synchronous>, transform_indices = @transform_5, window_bounds = array<i64: 128, 32>}, {pipeline_mode = #tpu.pipeline_mode<synchronous>, transform_indices = @transform_6, window_bounds = array<i64: 1, 32>}, {pipeline_mode = #tpu.pipeline_mode<synchronous>, transform_indices = @transform_7, window_bounds = array<i64: 32, 128>}, {pipeline_mode = #tpu.pipeline_mode<synchronous>, transform_indices = @transform_8, window_bounds = array<i64: 1, 128>}, {pipeline_mode = #tpu.pipeline_mode<synchronous>, transform_indices = @transform_9, window_bounds = array<i64: 128, 32>}, {pipeline_mode = #tpu.pipeline_mode<synchronous>, transform_indices = @transform_10, window_bounds = array<i64: 1, 32>}, {transform_indices = @transform_11, window_bounds = array<i64: 1>}, {pipeline_mode = #tpu.pipeline_mode<synchronous>, transform_indices = @transform_12, window_bounds = array<i64: 2, 128>}, {pipeline_mode = #tpu.pipeline_mode<synchronous>, transform_indices = @transform_13, window_bounds = array<i64: 2, 128>}, {pipeline_mode = #tpu.pipeline_mode<synchronous>, transform_indices = @transform_14, window_bounds = array<i64: 6, 128>}]} {
    %c0 = arith.constant 0 : index
    %c0_0 = arith.constant 0 : index
    %0 = vector.load %arg3[%c0, %c0_0] : memref<32x32xf32, #tpu.memory_space<vmem>>, vector<32x32xf32>
    %c0_1 = arith.constant 0 : index
    %c0_2 = arith.constant 0 : index
    %1 = vector.load %arg4[%c0_1, %c0_2] : memref<32x32xf32, #tpu.memory_space<vmem>>, vector<32x32xf32>
    %cst = arith.constant dense<0.000000e+00> : vector<32x32xf32>
    %2 = tpu.matmul %0, %1, %cst {dimension_numbers = #tpu.dot_dimension_numbers<[1], [0], [0], [1], [0, 0, 1, 1], [], []>} : vector<32x32xf32>, vector<32x32xf32>, vector<32x32xf32> -> vector<32x32xf32>
    %c0_3 = arith.constant 0 : index
    %c0_4 = arith.constant 0 : index
    %3 = vector.load %arg5[%c0_3, %c0_4] : memref<1x32xf32, #tpu.memory_space<vmem>>, vector<1x32xf32>
    %4 = vector.broadcast %3 : vector<1x32xf32> to vector<32x32xf32>
    %5 = arith.addf %2, %4 : vector<32x32xf32>
    %6 = math.tanh %5 : vector<32x32xf32>
    %c0_5 = arith.constant 0 : index
    %c0_6 = arith.constant 0 : index
    %7 = vector.load %arg18[%c0_5, %c0_6] : memref<32x32xf32, #tpu.memory_space<vmem>>, vector<32x32xf32>
    tpu.vector_store %arg18[%c0_5, %c0_6], %6 {strides = array<i32>} : memref<32x32xf32, #tpu.memory_space<vmem>>, vector<32x32xf32>,
    %8 = vector.extract_strided_slice %6 {offsets = [0, 0], sizes = [1, 32], strides = [1, 1]} : vector<32x32xf32> to vector<1x32xf32>
    %9 = vector.extract_strided_slice %6 {offsets = [16, 0], sizes = [1, 32], strides = [1, 1]} : vector<32x32xf32> to vector<1x32xf32>
    %10 = tpu.concatenate %8, %9 in 0 : vector<1x32xf32>, vector<1x32xf32> -> vector<2x32xf32>
    %c0_7 = arith.constant 0 : index
    %c0_8 = arith.constant 0 : index
    %11 = memref.load %arg1[%c0_7, %c0_8] : memref<2x3xi32, #tpu.memory_space<smem>>
    %c0_9 = arith.constant 0 : index
    %12 = memref.load %arg2[%c0_9] : memref<2xi32, #tpu.memory_space<smem>>
    %c0_i32 = arith.constant 0 : i32
    %13 = arith.cmpi sgt, %12, %c0_i32 : i32
    %14 = arith.extui %13 : i1 to i32
    %15 = arith.sitofp %14 : i32 to f32
    %c0_i32_10 = arith.constant 0 : i32
    %16 = arith.addi %c0_i32_10, %11 : i32
    %17 = arith.index_cast %16 : i32 to index
    %c0_11 = arith.constant 0 : index
    %18 = vector.load %arg18[%17, %c0_11] : memref<32x32xf32, #tpu.memory_space<vmem>>, vector<1x32xf32>
    %19 = vector.broadcast %15 : f32 to vector<1x32xf32>
    %20 = arith.mulf %18, %19 : vector<1x32xf32>
    %c0_12 = arith.constant 0 : index
    %c1 = arith.constant 1 : index
    %21 = memref.load %arg1[%c0_12, %c1] : memref<2x3xi32, #tpu.memory_space<smem>>
    %c0_13 = arith.constant 0 : index
    %22 = memref.load %arg2[%c0_13] : memref<2xi32, #tpu.memory_space<smem>>
    %c1_i32 = arith.constant 1 : i32
    %23 = arith.cmpi sgt, %22, %c1_i32 : i32
    %24 = arith.extui %23 : i1 to i32
    %25 = arith.sitofp %24 : i32 to f32
    %c0_i32_14 = arith.constant 0 : i32
    %26 = arith.addi %c0_i32_14, %21 : i32
    %27 = arith.index_cast %26 : i32 to index
    %c0_15 = arith.constant 0 : index
    %28 = vector.load %arg18[%27, %c0_15] : memref<32x32xf32, #tpu.memory_space<vmem>>, vector<1x32xf32>
    %29 = vector.broadcast %25 : f32 to vector<1x32xf32>
    %30 = arith.mulf %28, %29 : vector<1x32xf32>
    %c0_16 = arith.constant 0 : index
    %c2 = arith.constant 2 : index
    %31 = memref.load %arg1[%c0_16, %c2] : memref<2x3xi32, #tpu.memory_space<smem>>
    %c0_17 = arith.constant 0 : index
    %32 = memref.load %arg2[%c0_17] : memref<2xi32, #tpu.memory_space<smem>>
    %c2_i32 = arith.constant 2 : i32
    %33 = arith.cmpi sgt, %32, %c2_i32 : i32
    %34 = arith.extui %33 : i1 to i32
    %35 = arith.sitofp %34 : i32 to f32
    %c0_i32_18 = arith.constant 0 : i32
    %36 = arith.addi %c0_i32_18, %31 : i32
    %37 = arith.index_cast %36 : i32 to index
    %c0_19 = arith.constant 0 : index
    %38 = vector.load %arg18[%37, %c0_19] : memref<32x32xf32, #tpu.memory_space<vmem>>, vector<1x32xf32>
    %39 = vector.broadcast %35 : f32 to vector<1x32xf32>
    %40 = arith.mulf %38, %39 : vector<1x32xf32>
    %c1_20 = arith.constant 1 : index
    %c0_21 = arith.constant 0 : index
    %41 = memref.load %arg1[%c1_20, %c0_21] : memref<2x3xi32, #tpu.memory_space<smem>>
    %c1_22 = arith.constant 1 : index
    %42 = memref.load %arg2[%c1_22] : memref<2xi32, #tpu.memory_space<smem>>
    %c0_i32_23 = arith.constant 0 : i32
    %43 = arith.cmpi sgt, %42, %c0_i32_23 : i32
    %44 = arith.extui %43 : i1 to i32
    %45 = arith.sitofp %44 : i32 to f32
    %c16_i32 = arith.constant 16 : i32
    %46 = arith.addi %c16_i32, %41 : i32
    %47 = arith.index_cast %46 : i32 to index
    %c0_24 = arith.constant 0 : index
    %48 = vector.load %arg18[%47, %c0_24] : memref<32x32xf32, #tpu.memory_space<vmem>>, vector<1x32xf32>
    %49 = vector.broadcast %45 : f32 to vector<1x32xf32>
    %50 = arith.mulf %48, %49 : vector<1x32xf32>
    %c1_25 = arith.constant 1 : index
    %c1_26 = arith.constant 1 : index
    %51 = memref.load %arg1[%c1_25, %c1_26] : memref<2x3xi32, #tpu.memory_space<smem>>
    %c1_27 = arith.constant 1 : index
    %52 = memref.load %arg2[%c1_27] : memref<2xi32, #tpu.memory_space<smem>>
    %c1_i32_28 = arith.constant 1 : i32
    %53 = arith.cmpi sgt, %52, %c1_i32_28 : i32
    %54 = arith.extui %53 : i1 to i32
    %55 = arith.sitofp %54 : i32 to f32
    %c16_i32_29 = arith.constant 16 : i32
    %56 = arith.addi %c16_i32_29, %51 : i32
    %57 = arith.index_cast %56 : i32 to index
    %c0_30 = arith.constant 0 : index
    %58 = vector.load %arg18[%57, %c0_30] : memref<32x32xf32, #tpu.memory_space<vmem>>, vector<1x32xf32>
    %59 = vector.broadcast %55 : f32 to vector<1x32xf32>
    %60 = arith.mulf %58, %59 : vector<1x32xf32>
    %c1_31 = arith.constant 1 : index
    %c2_32 = arith.constant 2 : index
    %61 = memref.load %arg1[%c1_31, %c2_32] : memref<2x3xi32, #tpu.memory_space<smem>>
    %c1_33 = arith.constant 1 : index
    %62 = memref.load %arg2[%c1_33] : memref<2xi32, #tpu.memory_space<smem>>
    %c2_i32_34 = arith.constant 2 : i32
    %63 = arith.cmpi sgt, %62, %c2_i32_34 : i32
    %64 = arith.extui %63 : i1 to i32
    %65 = arith.sitofp %64 : i32 to f32
    %c16_i32_35 = arith.constant 16 : i32
    %66 = arith.addi %c16_i32_35, %61 : i32
    %67 = arith.index_cast %66 : i32 to index
    %c0_36 = arith.constant 0 : index
    %68 = vector.load %arg18[%67, %c0_36] : memref<32x32xf32, #tpu.memory_space<vmem>>, vector<1x32xf32>
    %69 = vector.broadcast %65 : f32 to vector<1x32xf32>
    %70 = arith.mulf %68, %69 : vector<1x32xf32>
    %71 = tpu.concatenate %20, %30, %40, %50, %60, %70 in 0 : vector<1x32xf32>, vector<1x32xf32>, vector<1x32xf32>, vector<1x32xf32>, vector<1x32xf32>, vector<1x32xf32> -> vector<6x32xf32>
    %c0_37 = arith.constant 0 : index
    %c0_38 = arith.constant 0 : index
    %72 = vector.load %arg6[%c0_37, %c0_38] : memref<32x128xf32, #tpu.memory_space<vmem>>, vector<32x128xf32>
    %cst_39 = arith.constant dense<0.000000e+00> : vector<2x128xf32>
    %73 = tpu.matmul %10, %72, %cst_39 {dimension_numbers = #tpu.dot_dimension_numbers<[1], [0], [0], [1], [0, 0, 1, 1], [], []>} : vector<2x32xf32>, vector<32x128xf32>, vector<2x128xf32> -> vector<2x128xf32>
    %c0_40 = arith.constant 0 : index
    %c0_41 = arith.constant 0 : index
    %74 = vector.load %arg7[%c0_40, %c0_41] : memref<1x128xf32, #tpu.memory_space<vmem>>, vector<1x128xf32>
    %75 = vector.broadcast %74 : vector<1x128xf32> to vector<2x128xf32>
    %76 = arith.addf %73, %75 : vector<2x128xf32>
    %cst_42 = arith.constant 0.000000e+00 : f32
    %77 = vector.broadcast %cst_42 : f32 to vector<2x128xf32>
    %78 = arith.maximumf %76, %77 : vector<2x128xf32>
    %c0_43 = arith.constant 0 : index
    %c0_44 = arith.constant 0 : index
    %79 = vector.load %arg8[%c0_43, %c0_44] : memref<128x32xf32, #tpu.memory_space<vmem>>, vector<128x32xf32>
    %cst_45 = arith.constant dense<0.000000e+00> : vector<2x32xf32>
    %80 = tpu.matmul %78, %79, %cst_45 {dimension_numbers = #tpu.dot_dimension_numbers<[1], [0], [0], [1], [0, 0, 1, 1], [], []>} : vector<2x128xf32>, vector<128x32xf32>, vector<2x32xf32> -> vector<2x32xf32>
    %c0_46 = arith.constant 0 : index
    %c0_47 = arith.constant 0 : index
    %81 = vector.load %arg9[%c0_46, %c0_47] : memref<1x32xf32, #tpu.memory_space<vmem>>, vector<1x32xf32>
    %82 = vector.broadcast %81 : vector<1x32xf32> to vector<2x32xf32>
    %83 = arith.addf %80, %82 : vector<2x32xf32>
    %c0_48 = arith.constant 0 : index
    %c0_49 = arith.constant 0 : index
    %84 = vector.load %arg10[%c0_48, %c0_49] : memref<32x128xf32, #tpu.memory_space<vmem>>, vector<32x128xf32>
    %cst_50 = arith.constant dense<0.000000e+00> : vector<6x128xf32>
    %85 = tpu.matmul %71, %84, %cst_50 {dimension_numbers = #tpu.dot_dimension_numbers<[1], [0], [0], [1], [0, 0, 1, 1], [], []>} : vector<6x32xf32>, vector<32x128xf32>, vector<6x128xf32> -> vector<6x128xf32>
    %c0_51 = arith.constant 0 : index
    %c0_52 = arith.constant 0 : index
    %86 = vector.load %arg11[%c0_51, %c0_52] : memref<1x128xf32, #tpu.memory_space<vmem>>, vector<1x128xf32>
    %87 = vector.broadcast %86 : vector<1x128xf32> to vector<6x128xf32>
    %88 = arith.addf %85, %87 : vector<6x128xf32>
    %cst_53 = arith.constant 0.000000e+00 : f32
    %89 = vector.broadcast %cst_53 : f32 to vector<6x128xf32>
    %90 = arith.maximumf %88, %89 : vector<6x128xf32>
    %c0_54 = arith.constant 0 : index
    %c0_55 = arith.constant 0 : index
    %91 = vector.load %arg12[%c0_54, %c0_55] : memref<128x32xf32, #tpu.memory_space<vmem>>, vector<128x32xf32>
    %cst_56 = arith.constant dense<0.000000e+00> : vector<6x32xf32>
    %92 = tpu.matmul %90, %91, %cst_56 {dimension_numbers = #tpu.dot_dimension_numbers<[1], [0], [0], [1], [0, 0, 1, 1], [], []>} : vector<6x128xf32>, vector<128x32xf32>, vector<6x32xf32> -> vector<6x32xf32>
    %c0_57 = arith.constant 0 : index
    %c0_58 = arith.constant 0 : index
    %93 = vector.load %arg13[%c0_57, %c0_58] : memref<1x32xf32, #tpu.memory_space<vmem>>, vector<1x32xf32>
    %94 = vector.broadcast %93 : vector<1x32xf32> to vector<6x32xf32>
    %95 = arith.addf %92, %94 : vector<6x32xf32>
    %96 = arith.mulf %83, %83 : vector<2x32xf32>
    %cst_59 = arith.constant dense<0.000000e+00> : vector<2xf32>
    %97 = vector.multi_reduction <add>, %96, %cst_59 [1] : vector<2x32xf32> to vector<2xf32>
    %98 = vector.shape_cast %97 : vector<2xf32> to vector<2x1xf32>
    %99 = math.sqrt %98 : vector<2x1xf32>
    %cst_60 = arith.constant 9.99999993E-9 : f32
    %100 = vector.broadcast %cst_60 : f32 to vector<2x1xf32>
    %101 = arith.addf %99, %100 : vector<2x1xf32>
    %102 = vector.broadcast %101 : vector<2x1xf32> to vector<2x32xf32>
    %103 = arith.divf %83, %102 : vector<2x32xf32>
    %104 = arith.mulf %95, %95 : vector<6x32xf32>
    %cst_61 = arith.constant dense<0.000000e+00> : vector<6xf32>
    %105 = vector.multi_reduction <add>, %104, %cst_61 [1] : vector<6x32xf32> to vector<6xf32>
    %106 = vector.shape_cast %105 : vector<6xf32> to vector<6x1xf32>
    %107 = math.sqrt %106 : vector<6x1xf32>
    %cst_62 = arith.constant 9.99999993E-9 : f32
    %108 = vector.broadcast %cst_62 : f32 to vector<6x1xf32>
    %109 = arith.addf %107, %108 : vector<6x1xf32>
    %110 = vector.broadcast %109 : vector<6x1xf32> to vector<6x32xf32>
    %111 = arith.divf %95, %110 : vector<6x32xf32>
    %c0_63 = arith.constant 0 : index
    %112 = memref.load %arg14[%c0_63] : memref<1xf32, #tpu.memory_space<smem>>
    %113 = vector.extract_strided_slice %103 {offsets = [0, 0], sizes = [1, 32], strides = [1, 1]} : vector<2x32xf32> to vector<1x32xf32>
    %114 = vector.extract_strided_slice %111 {offsets = [0, 0], sizes = [3, 32], strides = [1, 1]} : vector<6x32xf32> to vector<3x32xf32>
    %cst_64 = arith.constant dense<0.000000e+00> : vector<1x3xf32>
    %115 = tpu.matmul %113, %114, %cst_64 {dimension_numbers = #tpu.dot_dimension_numbers<[1], [1], [0], [0], [0, 0, 1, 0], [], []>} : vector<1x32xf32>, vector<3x32xf32>, vector<1x3xf32> -> vector<1x3xf32>
    %116 = vector.extract_strided_slice %103 {offsets = [1, 0], sizes = [1, 32], strides = [1, 1]} : vector<2x32xf32> to vector<1x32xf32>
    %117 = vector.extract_strided_slice %111 {offsets = [3, 0], sizes = [3, 32], strides = [1, 1]} : vector<6x32xf32> to vector<3x32xf32>
    %cst_65 = arith.constant dense<0.000000e+00> : vector<1x3xf32>
    %118 = tpu.matmul %116, %117, %cst_65 {dimension_numbers = #tpu.dot_dimension_numbers<[1], [1], [0], [0], [0, 0, 1, 0], [], []>} : vector<1x32xf32>, vector<3x32xf32>, vector<1x3xf32> -> vector<1x3xf32>
    %119 = tpu.concatenate %115, %118 in 0 : vector<1x3xf32>, vector<1x3xf32> -> vector<2x3xf32>
    %120 = vector.broadcast %112 : f32 to vector<2x3xf32>
    %121 = arith.mulf %119, %120 : vector<2x3xf32>
    %cst_66 = arith.constant 0.000000e+00 : f32
    %122 = vector.broadcast %cst_66 : f32 to vector<2x125xf32>
    %123 = tpu.concatenate %121, %122 in 1 : vector<2x3xf32>, vector<2x125xf32> -> vector<2x128xf32>
    %c0_67 = arith.constant 0 : index
    %c0_68 = arith.constant 0 : index
    %124 = vector.load %arg15[%c0_67, %c0_68] : memref<2x128xf32, #tpu.memory_space<vmem>>, vector<2x128xf32>
    tpu.vector_store %arg15[%c0_67, %c0_68], %123 {strides = array<i32>} : memref<2x128xf32, #tpu.memory_space<vmem>>, vector<2x128xf32>,
    %cst_69 = arith.constant 0.000000e+00 : f32
    %125 = vector.broadcast %cst_69 : f32 to vector<2x96xf32>
    %126 = tpu.concatenate %103, %125 in 1 : vector<2x32xf32>, vector<2x96xf32> -> vector<2x128xf32>
    %c0_70 = arith.constant 0 : index
    %c0_71 = arith.constant 0 : index
    %127 = vector.load %arg16[%c0_70, %c0_71] : memref<2x128xf32, #tpu.memory_space<vmem>>, vector<2x128xf32>
    tpu.vector_store %arg16[%c0_70, %c0_71], %126 {strides = array<i32>} : memref<2x128xf32, #tpu.memory_space<vmem>>, vector<2x128xf32>,
    %cst_72 = arith.constant 0.000000e+00 : f32
    %128 = vector.broadcast %cst_72 : f32 to vector<6x96xf32>
    %129 = tpu.concatenate %111, %128 in 1 : vector<6x32xf32>, vector<6x96xf32> -> vector<6x128xf32>
    %c0_73 = arith.constant 0 : index
    %c0_74 = arith.constant 0 : index
    %130 = vector.load %arg17[%c0_73, %c0_74] : memref<6x128xf32, #tpu.memory_space<vmem>>, vector<6x128xf32>
    tpu.vector_store %arg17[%c0_73, %c0_74], %129 {strides = array<i32>} : memref<6x128xf32, #tpu.memory_space<vmem>>, vector<6x128xf32>,
    return
  }
  func.func @transform_0(%arg0: i32, %arg1: memref<2x3xi32, #tpu.memory_space<smem>>, %arg2: memref<2xi32, #tpu.memory_space<smem>>) -> (i32, i32) {
    %c0_i32 = arith.constant 0 : i32
    %c0_i32_0 = arith.constant 0 : i32
    %c0_i32_1 = arith.constant 0 : i32
    return %c0_i32, %c0_i32_0 : i32, i32
  }
  func.func @transform_1(%arg0: i32, %arg1: memref<2x3xi32, #tpu.memory_space<smem>>, %arg2: memref<2xi32, #tpu.memory_space<smem>>) -> (i32, i32) {
    %c0_i32 = arith.constant 0 : i32
    %c0_i32_0 = arith.constant 0 : i32
    %c0_i32_1 = arith.constant 0 : i32
    return %c0_i32, %c0_i32_0 : i32, i32
  }
  func.func @transform_2(%arg0: i32, %arg1: memref<2x3xi32, #tpu.memory_space<smem>>, %arg2: memref<2xi32, #tpu.memory_space<smem>>) -> (i32, i32) {
    %c0_i32 = arith.constant 0 : i32
    %c0_i32_0 = arith.constant 0 : i32
    %c0_i32_1 = arith.constant 0 : i32
    return %c0_i32, %c0_i32_0 : i32, i32
  }
  func.func @transform_3(%arg0: i32, %arg1: memref<2x3xi32, #tpu.memory_space<smem>>, %arg2: memref<2xi32, #tpu.memory_space<smem>>) -> (i32, i32) {
    %c0_i32 = arith.constant 0 : i32
    %c0_i32_0 = arith.constant 0 : i32
    %c0_i32_1 = arith.constant 0 : i32
    return %c0_i32, %c0_i32_0 : i32, i32
  }
  func.func @transform_4(%arg0: i32, %arg1: memref<2x3xi32, #tpu.memory_space<smem>>, %arg2: memref<2xi32, #tpu.memory_space<smem>>) -> (i32, i32) {
    %c0_i32 = arith.constant 0 : i32
    %c0_i32_0 = arith.constant 0 : i32
    %c0_i32_1 = arith.constant 0 : i32
    return %c0_i32, %c0_i32_0 : i32, i32
  }
  func.func @transform_5(%arg0: i32, %arg1: memref<2x3xi32, #tpu.memory_space<smem>>, %arg2: memref<2xi32, #tpu.memory_space<smem>>) -> (i32, i32) {
    %c0_i32 = arith.constant 0 : i32
    %c0_i32_0 = arith.constant 0 : i32
    %c0_i32_1 = arith.constant 0 : i32
    return %c0_i32, %c0_i32_0 : i32, i32
  }
  func.func @transform_6(%arg0: i32, %arg1: memref<2x3xi32, #tpu.memory_space<smem>>, %arg2: memref<2xi32, #tpu.memory_space<smem>>) -> (i32, i32) {
    %c0_i32 = arith.constant 0 : i32
    %c0_i32_0 = arith.constant 0 : i32
    %c0_i32_1 = arith.constant 0 : i32
    return %c0_i32, %c0_i32_0 : i32, i32
  }
  func.func @transform_7(%arg0: i32, %arg1: memref<2x3xi32, #tpu.memory_space<smem>>, %arg2: memref<2xi32, #tpu.memory_space<smem>>) -> (i32, i32) {
    %c0_i32 = arith.constant 0 : i32
    %c0_i32_0 = arith.constant 0 : i32
    %c0_i32_1 = arith.constant 0 : i32
    return %c0_i32, %c0_i32_0 : i32, i32
  }
  func.func @transform_8(%arg0: i32, %arg1: memref<2x3xi32, #tpu.memory_space<smem>>, %arg2: memref<2xi32, #tpu.memory_space<smem>>) -> (i32, i32) {
    %c0_i32 = arith.constant 0 : i32
    %c0_i32_0 = arith.constant 0 : i32
    %c0_i32_1 = arith.constant 0 : i32
    return %c0_i32, %c0_i32_0 : i32, i32
  }
  func.func @transform_9(%arg0: i32, %arg1: memref<2x3xi32, #tpu.memory_space<smem>>, %arg2: memref<2xi32, #tpu.memory_space<smem>>) -> (i32, i32) {
    %c0_i32 = arith.constant 0 : i32
    %c0_i32_0 = arith.constant 0 : i32
    %c0_i32_1 = arith.constant 0 : i32
    return %c0_i32, %c0_i32_0 : i32, i32
  }
  func.func @transform_10(%arg0: i32, %arg1: memref<2x3xi32, #tpu.memory_space<smem>>, %arg2: memref<2xi32, #tpu.memory_space<smem>>) -> (i32, i32) {
    %c0_i32 = arith.constant 0 : i32
    %c0_i32_0 = arith.constant 0 : i32
    %c0_i32_1 = arith.constant 0 : i32
    return %c0_i32, %c0_i32_0 : i32, i32
  }
  func.func @transform_11(%arg0: i32, %arg1: memref<2x3xi32, #tpu.memory_space<smem>>, %arg2: memref<2xi32, #tpu.memory_space<smem>>) -> i32 {
    %c0_i32 = arith.constant 0 : i32
    %c0_i32_0 = arith.constant 0 : i32
    return %c0_i32 : i32
  }
  func.func @transform_12(%arg0: i32, %arg1: memref<2x3xi32, #tpu.memory_space<smem>>, %arg2: memref<2xi32, #tpu.memory_space<smem>>) -> (i32, i32) {
    %c0_i32 = arith.constant 0 : i32
    %c0_i32_0 = arith.constant 0 : i32
    %c0_i32_1 = arith.constant 0 : i32
    return %c0_i32, %c0_i32_0 : i32, i32
  }
  func.func @transform_13(%arg0: i32, %arg1: memref<2x3xi32, #tpu.memory_space<smem>>, %arg2: memref<2xi32, #tpu.memory_space<smem>>) -> (i32, i32) {
    %c0_i32 = arith.constant 0 : i32
    %c0_i32_0 = arith.constant 0 : i32
    %c0_i32_1 = arith.constant 0 : i32
    return %c0_i32, %c0_i32_0 : i32, i32
  }
  func.func @transform_14(%arg0: i32, %arg1: memref<2x3xi32, #tpu.memory_space<smem>>, %arg2: memref<2xi32, #tpu.memory_space<smem>>) -> (i32, i32) {
    %c0_i32 = arith.constant 0 : i32
    %c0_i32_0 = arith.constant 0 : i32
    %c0_i32_1 = arith.constant 0 : i32
    return %c0_i32, %c0_i32_0 : i32, i32
  }
}

</mosaic_0001>

<bundles_post_ra>
// kernel: gliclass_uni_encoder_forward.1
= control target key start
LH: loop header
LB: loop body
LE: loop exit
PB: predicated region body
PF: predicated region fallthrough
CT: control target
= control target key end

     0   :  { %s1517_s0 = inlined_call_operand.vmem [shape: s32[2,3], index: 0, kind: input, shape index: {}]   ;;  %s1518_s2 = inlined_call_operand.vmem [shape: f32[32,32], index: 2, kind: input, shape index: {}]   ;;  %s1519_s3 = inlined_call_operand.vmem [shape: f32[32,32], index: 3, kind: input, shape index: {}]   ;;  %s1520_s4 = inlined_call_operand.vmem [shape: f32[1,32], index: 4, kind: input, shape index: {}]   ;;  %s1521_s5 = inlined_call_operand.vmem [shape: f32[32,128], index: 5, kind: input, shape index: {}]   ;;  %s1522_s6 = inlined_call_operand.vmem [shape: f32[1,128], index: 6, kind: input, shape index: {}]   ;;  %s1523_s7 = inlined_call_operand.vmem [shape: f32[128,32], index: 7, kind: input, shape index: {}]   ;;  %s1524_s8 = inlined_call_operand.vmem [shape: f32[1,32], index: 8, kind: input, shape index: {}]   ;;  %s1525_s9 = inlined_call_operand.vmem [shape: f32[32,128], index: 9, kind: input, shape index: {}]   ;;  %s1526_s10 = inlined_call_operand.vmem [shape: f32[1,128], index: 10, kind: input, shape index: {}]   ;;  %s1527_s11 = inlined_call_operand.vmem [shape: f32[128,32], index: 11, kind: input, shape index: {}]   ;;  %s1528_s12 = inlined_call_operand.vmem [shape: f32[1,32], index: 12, kind: input, shape index: {}]   ;;  %s1529_s13 = inlined_call_operand.<no memory space> [shape: f32[1], index: 13, kind: input, shape index: {}]   ;;  %s1530_s14 = inlined_call_operand.hbm [shape: f32[2,128], index: 14, kind: output, shape index: {0}]   ;;  %s1531_s15 = inlined_call_operand.hbm [shape: f32[2,128], index: 15, kind: output, shape index: {1}]   ;;  %s1532_s16 = inlined_call_operand.vmem [shape: f32[6,128], index: 16, kind: output, shape index: {2}]   ;;  %s1533_s1 = inlined_call_operand.vmem [shape: s32[2], index: 1, kind: input, shape index: {}]  }
   0x1   :  { %1534 = sst [smem:[#allocation14_spill]] %s1517_s0  ;;  %s26_s26 = sshll.u32 %s1533_s1, 4  ;;  %s27_s26 = int_to_ptr.vmem [resolvable:$true] %s26_s26 }
   0x2   :  { %1535 = sst [smem:[#allocation15_spill]] %s1524_s8 }
   0x3   :  { %1536 = sst [smem:[#allocation16_spill]] %s1530_s14 }
   0x4   :  { %s1537_s23 = sld [smem:[#allocation14_spill]] }
   0xa   :  { %s22_s8 = sshll.u32 %s1537_s23, 4  ;;  %s23_s8 = int_to_ptr.vmem [resolvable:$true] %s22_s8 }
   0xb   :  { %s1073_s27 = scalar_lea.vmem %s23_s8, 32  ;;  %p1078_p1 = scmp.lt.s32.totalorder %s23_s8, %s23_s8 }
   0xc   :  { %p1074_p0 = scmp.ne.s32.totalorder %s23_s8, %s1073_s27  ;;  %p1079_p2 = scmp.lt.s32.totalorder %s1073_s27, %s1073_s27 }
   0xe   :  { %p1080_p3 = por %p1079_p2, %p1078_p1 }
  0x10   :  { %p1081_p4 = pnand %p1080_p3, %p1074_p0 }
  0x12   :  { %1084 = shalt.err (!%p1081_p4)  }
  0x13   :  { %s1143_s28 = smov [#allocation4]   ;;  %s1085_s29 = scalar_lea.vmem %s27_s26, 16 }
  0x14   :  { %25 = dma.vmem_to_smem %s23_s8, 32, %s1143_s28, [#allocation3] }
  0x15   :  { %p1086_p5 = scmp.ne.s32.totalorder %s27_s26, %s1085_s29  ;;  %p1090_p6 = scmp.lt.s32.totalorder %s27_s26, %s27_s26 }
  0x16   :  { %p1091_p7 = scmp.lt.s32.totalorder %s1085_s29, %s1085_s29 }
  0x18   :  { %p1092_p8 = por %p1091_p7, %p1090_p6 }
  0x1a   :  { %p1093_p9 = pnand %p1092_p8, %p1086_p5 }
  0x1c   :  { %1096 = shalt.err (!%p1093_p9)  }
  0x1d   :  { %s1144_s30 = smov [#allocation5]  }
  0x1e   :  { %29 = dma.vmem_to_smem %s27_s26, 16, %s1144_s30, [#allocation3] }
  0x1f   :  { %1137 = dma.done.wait [#allocation3], 48 }
  0x20   :  { %1138 = vsyncadd [#allocation3], 4294967248 }
  0x21   :  { %32 = sfence }
  0x22   :  { %33 = vsyncpa [#allocation8], 0  ;;  %v66_v0 = vld [vmem:[%s1519_s3 + $0x18] sm:$0xff]  ;;  %v65_v1 = vld [vmem:[%s1519_s3 + $0x10] sm:$0xff]  ;;  %vm74_vm0 = vcmask 261120  }
  0x23   :  { %935 = vmatprep.subr.mxu0 %v66_v0  ;;  %v59_v2 = vld [vmem:[%s1518_s2] sm:$0xff]  ;;  %v64_v3 = vld [vmem:[%s1519_s3 + $0x8] sm:$0xff] }
  0x24   :  { %936 = vmatpush3.msra.mxu0 %v66_v0  ;;  %943 = vmatprep.mubr.msk.f32.mxu0 %vm74_vm0, %v59_v2 }
  0x25   :  { %34 = vsyncpa [#allocation10], 0  ;;  %937 = vmatprep.subr.mxu0 %v65_v1  ;;  %v63_v4 = vld [vmem:[%s1519_s3] sm:$0xff]  ;;  %v60_v5 = vld [vmem:[%s1518_s2 + $0x8] sm:$0xff]  ;;  %v1145_v8 = vmov 0.0   ;;  %vm1146_vm1 = vmmov 0  }
  0x26   :  { %938 = vmatpush3.msra.mxu0 %v65_v1  ;;  %v61_v6 = vld [vmem:[%s1518_s2 + $0x10] sm:$0xff]  ;;  %v62_v7 = vld [vmem:[%s1518_s2 + $0x18] sm:$0xff]  ;;  %949 = vmatprep.subr.mxu1 %v1145_v8  ;;  %v263_v11 = vld [vmem:[%s1521_s5 + $0x8] sm:$0xff]  ;;  %s186_s26 = sld [smem:[#allocation5]]  ;;  %vm183_vm2 = vcmask 1040384   ;;  %vm254_vm3 = vcmask 1041408  }
  0x27   :  { %939 = vmatprep.subr.mxu0 %v64_v3  ;;  %v265_v9 = vld [vmem:[%s1521_s5 + $0x18] sm:$0xff]  ;;  %v264_v10 = vld [vmem:[%s1521_s5 + $0x10] sm:$0xff]  ;;  %v262_v12 = vld [vmem:[%s1521_s5] sm:$0xff]  ;;  %957 = vmatprep.mubr.msk.f32.mxu1 %vm1146_vm1, %v1145_v8  ;;  %s863_s27 = sld [smem:[#allocation5 + $0x1]]  ;;  %vm256_vm4 = vcmask 1042432   ;;  %vm258_vm5 = vcmask 1043456  }
  0x28   :  { %940 = vmatpush3.msra.mxu0 %v64_v3  ;;  %950 = vmatpush3.msra.mxu1 %v265_v9  ;;  %v362_v13 = vld [vmem:[%s1523_s7 + $0x78] sm:$0xff]  ;;  %v361_v14 = vld [vmem:[%s1523_s7 + $0x70] sm:$0xff]  ;;  %v360_v15 = vld [vmem:[%s1523_s7 + $0x68] sm:$0xff]  ;;  %s1345_s28 = sld [smem:[#allocation4]]  ;;  %vm260_vm6 = vcmask 1044480   ;;  %vm634_vm7 = vcmask 259072  }
  0x29   :  { %941 = vmatprep.subr.mxu0 %v63_v4  ;;  %951 = vmatprep.subr.mxu1 %v1145_v8  ;;  %v359_v16 = vld [vmem:[%s1523_s7 + $0x60] sm:$0xff]  ;;  %v358_v17 = vld [vmem:[%s1523_s7 + $0x58] sm:$0xff]  ;;  %v357_v18 = vld [vmem:[%s1523_s7 + $0x50] sm:$0xff]  ;;  %s1347_s29 = sld [smem:[#allocation4 + $0x1]]  ;;  %vm619_vm8 = vcmask 254976  }
  0x2a   :  { %942 = vmatpush3.msra.mxu0 %v63_v4  ;;  %952 = vmatpush3.msra.mxu1 %v264_v10  ;;  %v356_v19 = vld [vmem:[%s1523_s7 + $0x48] sm:$0xff]  ;;  %v355_v20 = vld [vmem:[%s1523_s7 + $0x40] sm:$0xff]  ;;  %v354_v21 = vld [vmem:[%s1523_s7 + $0x38] sm:$0xff]  ;;  %s1353_s30 = sld [smem:[#allocation4 + $0x2]] }
  0x2b   :  { %944 = vmatmul.mubr.msk.f32.vlgmr.msra.gmra.mxu0 %vm74_vm0, %v60_v5  ;;  %960 = vmatprep.subr.mxu0 %v1145_v8  ;;  %v353_v22 = vld [vmem:[%s1523_s7 + $0x30] sm:$0xff]  ;;  %v352_v23 = vld [vmem:[%s1523_s7 + $0x28] sm:$0xff]  ;;  %v351_v24 = vld [vmem:[%s1523_s7 + $0x20] sm:$0xff]  ;;  %s1358_s0 = sld [smem:[#allocation4 + $0x80]] }
  0x2c   :  { %946 = vmatprep.mubr.msk.f32.mxu0 %vm74_vm0, %v61_v6  ;;  %953 = vmatprep.subr.mxu1 %v1145_v8  ;;  %v350_v25 = vld [vmem:[%s1523_s7 + $0x18] sm:$0xff]  ;;  %v855_v26 = vld [vmem:[%s1520_s4] ss:$0 sm:$0xff]  ;;  %p187_p10 = scmp.gt.s32.totalorder %s186_s26, 0  ;;  %p195_p11 = scmp.gt.s32.totalorder %s186_s26, 1  ;;  %v442_v42 = vld [vmem:[%s1525_s9 + $0x10] sm:$0xff] }
  0x2d   :  { %954 = vmatpush3.msra.mxu1 %v263_v11  ;;  %961 = vmatpush3.msra.mxu0 %v362_v13  ;;  %p203_p12 = scmp.gt.s32.totalorder %s186_s26, 2  ;;  %p212_p13 = scmp.gt.s32.totalorder %s863_s27, 0  ;;  %v443_v40 = vld [vmem:[%s1525_s9 + $0x18] sm:$0xff]  ;;  %v441_v45 = vld [vmem:[%s1525_s9 + $0x8] sm:$0xff]  ;;  %v440_v47 = vld [vmem:[%s1525_s9] sm:$0xff] }
  0x2e   :  { %955 = vmatprep.subr.mxu1 %v1145_v8  ;;  %962 = vmatprep.subr.mxu0 %v1145_v8  ;;  %s1349_s4 = scalar_select %p187_p10, 1, 0  ;;  %v540_v9 = vld [vmem:[%s1527_s11 + $0x78] sm:$0xff]  ;;  %v539_v11 = vld [vmem:[%s1527_s11 + $0x70] sm:$0xff]  ;;  %v537_v13 = vld [vmem:[%s1527_s11 + $0x60] sm:$0xff] }
  0x2f   :  { %947 = vmatmul.mubr.msk.f32.gmra.mxu0 %vm74_vm0, %v62_v7  ;;  %956 = vmatpush3.msra.mxu1 %v262_v12  ;;  %s1351_s3 = scalar_select %p195_p11, 1, 0  ;;  %v538_v12 = vld [vmem:[%s1527_s11 + $0x68] sm:$0xff] }
  0x30   :  { %992 = vmatprep.mubr.msk.f32.mxu0 %vm1146_vm1, %v1145_v8  ;;  %995 = vmatprep.subr.mxu1 %v1145_v8  ;;  %s1355_s1 = scalar_select %p203_p12, 1, 0 }
  0x31   :  { %963 = vmatpush3.msra.mxu0 %v361_v14  ;;  %p221_p0 = scmp.gt.s32.totalorder %s863_s27, 1  ;;  %s1360_s2 = sld [smem:[#allocation4 + $0x81]]  ;;  %v536_v14 = vld [vmem:[%s1527_s11 + $0x58] sm:$0xff] }
  0x32   :  { %964 = vmatprep.subr.mxu0 %v1145_v8  ;;  %p230_p1 = scmp.gt.s32.totalorder %s863_s27, 2  ;;  %s1365_s18 = sld [smem:[#allocation4 + $0x82]] }
  0x33   :  { %965 = vmatpush3.msra.mxu0 %v360_v15  ;;  %s1363_s17 = scalar_select %p212_p13, 1, 0  ;;  %v535_v15 = vld [vmem:[%s1527_s11 + $0x50] sm:$0xff] }
  0x34   :  { %966 = vmatprep.subr.mxu0 %v1145_v8  ;;  %s222_s8 = scalar_select %p221_p0, 1, 0 }
  0x35   :  { %967 = vmatpush3.msra.mxu0 %v359_v16  ;;  %s1368_s19 = scalar_select %p230_p1, 1, 0  ;;  %v349_v16 = vld [vmem:[%s1523_s7 + $0x10] sm:$0xff] }
  0x36   :  { %968 = vmatprep.subr.mxu0 %v1145_v8  ;;  %s189_s20 = scvt.s32.f32 %s1349_s4  ;;  %s197_s21 = scvt.s32.f32 %s1351_s3 }
  0x37   :  { %969 = vmatpush3.msra.mxu0 %v358_v17  ;;  %s205_s22 = scvt.s32.f32 %s1355_s1  ;;  %s214_s24 = scvt.s32.f32 %s1363_s17  ;;  %v534_v17 = vld [vmem:[%s1527_s11 + $0x48] sm:$0xff] }
  0x38   :  { %970 = vmatprep.subr.mxu0 %v1145_v8  ;;  %s223_s25 = scvt.s32.f32 %s222_s8  ;;  %s232_s14 = scvt.s32.f32 %s1368_s19  ;;  %v200_v43 = vstv %s197_s21  ;;  %v192_v46 = vstv %s189_s20 }
  0x39   :  { %971 = vmatpush3.msra.mxu0 %v357_v18  ;;  %v208_v44 = vstv %s205_s22  ;;  %v218_v48 = vstv %s214_s24  ;;  %s190_s8 = scalar_lea.vmem [#allocation2], %s1345_s28  ;;  %s198_s19 = scalar_lea.vmem [#allocation2], %s1347_s29  ;;  %v348_v18 = vld [vmem:[%s1523_s7 + $0x8] sm:$0xff] }
  0x3a   :  { %972 = vmatprep.subr.mxu0 %v1145_v8  ;;  %v227_v49 = vstv %s223_s25  ;;  %s206_s21 = scalar_lea.vmem [#allocation2], %s1353_s30  ;;  %v236_v53 = vstv %s232_s14  ;;  %s849_s20 = scalar_lea.vmem [#allocation2], %s1358_s0 }
  0x3b   :  { %973 = vmatpush3.msra.mxu0 %v356_v19  ;;  %s851_s22 = scalar_lea.vmem [#allocation2], %s1360_s2  ;;  %s853_s9 = scalar_lea.vmem [#allocation2], %s1365_s18  ;;  %v533_v19 = vld [vmem:[%s1527_s11 + $0x40] sm:$0xff] }
  0x3c   :  { %974 = vmatprep.subr.mxu0 %v1145_v8 }
  0x3d   :  { %975 = vmatpush3.msra.mxu0 %v355_v20  ;;  %v347_v20 = vld [vmem:[%s1523_s7] sm:$0xff] }
  0x3e   :  { %976 = vmatprep.subr.mxu0 %v1145_v8 }
  0x3f   :  { %977 = vmatpush3.msra.mxu0 %v354_v21  ;;  %v532_v21 = vld [vmem:[%s1527_s11 + $0x38] sm:$0xff] }
  0x40   :  { %978 = vmatprep.subr.mxu0 %v1145_v8 }
  0x41   :  { %979 = vmatpush3.msra.mxu0 %v353_v22  ;;  %v531_v22 = vld [vmem:[%s1527_s11 + $0x30] sm:$0xff] }
  0x42   :  { %980 = vmatprep.subr.mxu0 %v1145_v8 }
  0x43   :  { %981 = vmatpush3.msra.mxu0 %v352_v23  ;;  %v530_v23 = vld [vmem:[%s1527_s11 + $0x28] sm:$0xff] }
  0x44   :  { %982 = vmatprep.subr.mxu0 %v1145_v8 }
  0x45   :  { %983 = vmatpush3.msra.mxu0 %v351_v24  ;;  %v529_v24 = vld [vmem:[%s1527_s11 + $0x20] sm:$0xff] }
  0x46   :  { %984 = vmatprep.subr.mxu0 %v1145_v8 }
  0x47   :  { %985 = vmatpush3.msra.mxu0 %v350_v25  ;;  %v528_v25 = vld [vmem:[%s1527_s11 + $0x18] sm:$0xff] }
  0x48   :  { %986 = vmatprep.subr.mxu0 %v1145_v8 }
  0x49   :  { %987 = vmatpush3.msra.mxu0 %v349_v16 }
  0x4a   :  { %988 = vmatprep.subr.mxu0 %v1145_v8 }
  0x4b   :  { %989 = vmatpush3.msra.mxu0 %v348_v18 }
  0x4c   :  { %990 = vmatprep.subr.mxu0 %v1145_v8 }
  0x4d   :  { %991 = vmatpush3.msra.mxu0 %v347_v20 }
  0x4e   :  { %1041 = vmatprep.subr.mxu0 %v1145_v8 }
  0xeb   :  { %v945_v27 = vpop.f32.mrf.mxu0 }
  0xec   :  { %v159_v28 = vadd.f32 %v945_v27, %v855_v26  ;;  %v526_v27 = vld [vmem:[%s1527_s11 + $0x8] sm:$0xff] }
  0xed   :  { %v153_v29 = vpop.f32.mrf.mxu0 }
  0xee   :  { %1057 = vtanh.f32 %v159_v28  ;;  %v154_v30 = vadd.f32 %v855_v26, %v153_v29  ;;  %v525_v28 = vld [vmem:[%s1527_s11] sm:$0xff] }
  0xef   :  { %v948_v31 = vpop.f32.mrf.mxu0  ;;  %v869_v29 = vld [vmem:[%s1522_s6] ss:$0 sm:$0xff] }
  0xf0   :  { %1059 = vtanh.f32 %v154_v30  ;;  %v169_v32 = vadd.f32 %v948_v31, %v855_v26 }
  0xf1   :  { %v163_v33 = vpop.f32.mrf.mxu0 }
  0xf2   :  { %1061 = vtanh.f32 %v169_v32  ;;  %v164_v34 = vadd.f32 %v855_v26, %v163_v33  ;;  %v527_v26 = vld [vmem:[%s1527_s11 + $0x10] sm:$0xff] }
  0xf4   :  { %1063 = vtanh.f32 %v164_v34  ;;  %v872_v34 = vld [vmem:[%s1526_s10] ss:$0 sm:$0xff] }
  0xfb   :  { %v1058_v35 = vpop.eup %1057 }
  0xfc   :  { %177 = vst.msk [vmem:[#allocation2 + $0x8] sm:$0xff] %vm74_vm0, %v1058_v35 }
  0xfd   :  { %v1060_v36 = vpop.eup %1059 }
  0xfe   :  { %176 = vst.msk [vmem:[#allocation2] sm:$0xff] %vm74_vm0, %v1060_v36 }
  0xff   :  { %v1062_v37 = vpop.eup %1061 }
 0x100   :  { %179 = vst.msk [vmem:[#allocation2 + $0x18] sm:$0xff] %vm74_vm0, %v1062_v37 }
 0x101   :  { %v1064_v38 = vpop.eup %1063 }
 0x102   :  { %178 = vst.msk [vmem:[#allocation2 + $0x10] sm:$0xff] %vm74_vm0, %v1064_v38  ;;  %v181_v39 = vrot.slane %v1064_v38, 7 }
 0x104   :  { %v184_v41 = vsel %vm183_vm2, %v1060_v36, %v181_v39 }
 0x105   :  { %958 = vmatmul.mubr.msk.f32.vlgmr.msra.gmra.mxu1 %vm74_vm0, %v184_v41 }
 0x106   :  { %996 = vmatpush3.msra.mxu1 %v443_v40  ;;  %1003 = vmatprep.mubr.msk.f32.mxu1 %vm1146_vm1, %v1145_v8 }
 0x107   :  { %997 = vmatprep.subr.mxu1 %v1145_v8 }
 0x108   :  { %998 = vmatpush3.msra.mxu1 %v442_v42  ;;  %v874_v42 = vld [vmem:[%s1528_s12] ss:$0 sm:$0xff] }
 0x109   :  { %v191_v50 = vld [vmem:[%s190_s8] sm:$0x1]  ;;  %999 = vmatprep.subr.mxu1 %v1145_v8  ;;  %v864_v56 = vld [vmem:[%s849_s20 + $0x10] sm:$0x1] }
 0x10a   :  { %v199_v51 = vld [vmem:[%s198_s19] sm:$0x1]  ;;  %1000 = vmatpush3.msra.mxu1 %v441_v45  ;;  %v866_v57 = vld [vmem:[%s851_s22 + $0x10] sm:$0x1]  ;;  %v219_v59 = vmul.f32 %v864_v56, %v218_v48  ;;  %v193_v61 = vmul.f32 %v192_v46, %v191_v50  ;;  %s1538_s19 = sld [smem:[#allocation15_spill]]  ;;  %s1147_s22 = smov [#allocation9]  }
 0x10b   :  { %v207_v52 = vld [vmem:[%s206_s21] sm:$0x1]  ;;  %v201_v54 = vmul.f32 %v200_v43, %v199_v51  ;;  %v868_v58 = vld [vmem:[%s853_s9 + $0x10] sm:$0x1]  ;;  %1001 = vmatprep.subr.mxu1 %v1145_v8  ;;  %v228_v60 = vmul.f32 %v866_v57, %v227_v49  ;;  %s830_s9 = sshll.u32 %s1147_s22, 4  ;;  %s831_s9 = int_to_ptr.vmem [resolvable:$true] %s830_s9 }
 0x10c   :  { %v209_v55 = vmul.f32 %v208_v44, %v207_v52  ;;  %1002 = vmatpush3.msra.mxu1 %v440_v47  ;;  %v237_v0 = vmul.f32 %v868_v58, %v236_v53  ;;  %v245_v2 = vrot.slane %v219_v59, 5  ;;  %p1102_p3 = scmp.lt.s32.totalorder %s831_s9, %s831_s9 }
 0x10d   :  { %v239_v62 = vrot.slane %v201_v54, 7  ;;  %1006 = vmatprep.subr.mxu1 %v1145_v8  ;;  %v248_v4 = vrot.slane %v228_v60, 4 }
 0x10e   :  { %v242_v63 = vrot.slane %v209_v55, 6  ;;  %v251_v5 = vrot.slane %v237_v0, 3 }
 0x10f   :  { %v253_v1 = vsel %vm183_vm2, %v193_v61, %v239_v62 }
 0x110   :  { %v255_v3 = vsel %vm254_vm3, %v253_v1, %v242_v63  ;;  %v871_v41 = vld [vmem:[%s1538_s19] ss:$0 sm:$0xff] }
 0x111   :  { %v257_v6 = vsel %vm256_vm4, %v255_v3, %v245_v2 }
 0x112   :  { %v259_v7 = vsel %vm258_vm5, %v257_v6, %v248_v4 }
 0x113   :  { %v261_v10 = vsel %vm260_vm6, %v259_v7, %v251_v5 }
 0x114   :  { %1004 = vmatmul.mubr.msk.f32.vlgmr.msra.gmra.mxu1 %vm74_vm0, %v261_v10 }
 0x115   :  { %1007 = vmatpush3.msra.mxu1 %v540_v9  ;;  %1038 = vmatprep.mubr.msk.f32.mxu1 %vm1146_vm1, %v1145_v8 }
 0x116   :  { %1008 = vmatprep.subr.mxu1 %v1145_v8 }
 0x117   :  { %1009 = vmatpush3.msra.mxu1 %v539_v11 }
 0x118   :  { %1010 = vmatprep.subr.mxu1 %v1145_v8 }
 0x119   :  { %1011 = vmatpush3.msra.mxu1 %v538_v12 }
 0x11a   :  { %1012 = vmatprep.subr.mxu1 %v1145_v8 }
 0x11b   :  { %1013 = vmatpush3.msra.mxu1 %v537_v13 }
 0x11c   :  { %1014 = vmatprep.subr.mxu1 %v1145_v8 }
 0x11d   :  { %1015 = vmatpush3.msra.mxu1 %v536_v14 }
 0x11e   :  { %1016 = vmatprep.subr.mxu1 %v1145_v8 }
 0x11f   :  { %1017 = vmatpush3.msra.mxu1 %v535_v15 }
 0x120   :  { %1018 = vmatprep.subr.mxu1 %v1145_v8 }
 0x121   :  { %1019 = vmatpush3.msra.mxu1 %v534_v17 }
 0x122   :  { %1020 = vmatprep.subr.mxu1 %v1145_v8 }
 0x123   :  { %1021 = vmatpush3.msra.mxu1 %v533_v19 }
 0x124   :  { %1022 = vmatprep.subr.mxu1 %v1145_v8 }
 0x125   :  { %1023 = vmatpush3.msra.mxu1 %v532_v21 }
 0x126   :  { %1024 = vmatprep.subr.mxu1 %v1145_v8 }
 0x127   :  { %1025 = vmatpush3.msra.mxu1 %v531_v22 }
 0x128   :  { %1026 = vmatprep.subr.mxu1 %v1145_v8 }
 0x129   :  { %1027 = vmatpush3.msra.mxu1 %v530_v23 }
 0x12a   :  { %1028 = vmatprep.subr.mxu1 %v1145_v8 }
 0x12b   :  { %1029 = vmatpush3.msra.mxu1 %v529_v24 }
 0x12c   :  { %1030 = vmatprep.subr.mxu1 %v1145_v8 }
 0x12d   :  { %1031 = vmatpush3.msra.mxu1 %v528_v25 }
 0x12e   :  { %1032 = vmatprep.subr.mxu1 %v1145_v8 }
 0x12f   :  { %1033 = vmatpush3.msra.mxu1 %v527_v26 }
 0x130   :  { %1034 = vmatprep.subr.mxu1 %v1145_v8 }
 0x131   :  { %1035 = vmatpush3.msra.mxu1 %v526_v27 }
 0x132   :  { %1036 = vmatprep.subr.mxu1 %v1145_v8 }
 0x133   :  { %1037 = vmatpush3.msra.mxu1 %v525_v28 }
 0x1c5   :  { %v342_v30 = vpop.f32.mrf.mxu1 }
 0x1c6   :  { %v343_v31 = vadd.f32 %v869_v29, %v342_v30 }
 0x1c7   :  { %v959_v32 = vpop.f32.mrf.mxu1 }
 0x1c8   :  { %v346_v33 = vmax.f32 %v343_v31, 0.0 }
 0x1ca   :  { %993 = vmatmul.mubr.f32.vlgmr.msra.gmra.mxu0 %v346_v33 }
 0x1cb   :  { %1043 = vmatprep.mubr.msk.f32.mxu0 %vm1146_vm1, %v1145_v8 }
 0x1d4   :  { %v520_v35 = vpop.f32.mrf.mxu1 }
 0x1d5   :  { %v521_v36 = vadd.f32 %v872_v34, %v520_v35 }
 0x1d6   :  { %v1005_v37 = vpop.f32.mrf.mxu1 }
 0x1d7   :  { %v524_v38 = vmax.f32 %v521_v36, 0.0 }
 0x1d9   :  { %1039 = vmatmul.mubr.f32.vlgmr.msra.gmra.mxu1 %v524_v38 }
 0x28a   :  { %v436_v39 = vpop.f32.mrf.mxu0 }
 0x28b   :  { %v437_v44 = vadd.f32 %v871_v41, %v436_v39 }
 0x28c   :  { %v994_v40 = vpop.f32.mrf.mxu0 }
 0x28d   :  { %v618_v49 = vmul.f32 %v437_v44, %v437_v44 }
 0x28f   :  { %v620_v50 = vsel %vm619_vm8, %v618_v49, 0.0 }
 0x299   :  { %v614_v43 = vpop.f32.mrf.mxu1 }
 0x29a   :  { %v615_v45 = vadd.f32 %v874_v42, %v614_v43 }
 0x29b   :  { %v1040_v46 = vpop.f32.mrf.mxu1 }
 0x29c   :  { %v633_v47 = vmul.f32 %v615_v45, %v615_v45 }
 0x29e   :  { %v635_v48 = vsel %vm634_vm7, %v633_v47, 0.0 }
 0x29f   :  { %636 = vadd.xlane.f32.xlu0 %v635_v48 }
 0x2a3   :  { %621 = vadd.xlane.f32.xlu0 %v620_v50 }
 0x328   :  { %v637_v51 = vpop.xlane.xlu0 %636 }
 0x329   :  { %1065 = vrsqrt.f32 %v637_v51  ;;  %vm640_vm9 = vcmp.eq.f32.partialorder %v637_v51, inf  ;;  %v643_v55 = vand.u32 2147483648, %v637_v51  ;;  %vm642_vm10 = vcmp.eq.f32.partialorder %v637_v51, 0.0 }
 0x32c   :  { %v622_v52 = vpop.xlane.xlu0 %621 }
 0x32d   :  { %1067 = vrsqrt.f32 %v622_v52  ;;  %vm625_vm11 = vcmp.eq.f32.partialorder %v622_v52, inf  ;;  %v628_v61 = vand.u32 2147483648, %v622_v52  ;;  %vm627_vm12 = vcmp.eq.f32.partialorder %v622_v52, 0.0 }
 0x336   :  { %v1066_v53 = vpop.eup %1065 }
 0x337   :  { %v639_v54 = vmul.f32 %v1066_v53, %v637_v51 }
 0x339   :  { %v641_v56 = vsel %vm640_vm9, %v637_v51, %v639_v54 }
 0x33a   :  { %v1068_v57 = vpop.eup %1067  ;;  %v644_v58 = vsel %vm642_vm10, %v643_v55, %v641_v56 }
 0x33b   :  { %v645_v59 = vadd.f32 1e-08, %v644_v58  ;;  %v624_v60 = vmul.f32 %v1068_v57, %v622_v52 }
 0x33d   :  { %1069 = vrcp.f32 %v645_v59  ;;  %v626_v62 = vsel %vm625_vm11, %v622_v52, %v624_v60 }
 0x33e   :  { %v629_v63 = vsel %vm627_vm12, %v628_v61, %v626_v62 }
 0x33f   :  { %v630_v0 = vadd.f32 1e-08, %v629_v63 }
 0x341   :  { %1071 = vrcp.f32 %v630_v0 }
 0x34a   :  { %v1070_v1 = vpop.eup %1069 }
 0x34b   :  { %v647_v2 = vmul.f32 %v1070_v1, %v615_v45 }
 0x34d   :  { %1042 = vmatpush3.xpose.msk.msra.mxu0 %vm74_vm0, %v647_v2  ;;  %v812_v3 = vsel %vm74_vm0, %v647_v2, 0.0  ;;  %v726_v6 = vrot.slane %v647_v2, 3 }
 0x34e   :  { %v1072_v4 = vpop.eup %1071  ;;  %813 = vst [vmem:[%s1532_s16] sm:$0x3f] %v812_v3  ;;  %1046 = vmatprep.subr.mxu0 %v1145_v8  ;;  %s1097_s16 = scalar_lea.vmem %s831_s9, 32 }
 0x34f   :  { %v632_v5 = vmul.f32 %v1072_v4, %v437_v44  ;;  %p1098_p2 = scmp.ne.s32.totalorder %s831_s9, %s1097_s16  ;;  %p1103_p4 = scmp.lt.s32.totalorder %s1097_s16, %s1097_s16 }
 0x351   :  { %1044 = vmatmul.mubr.msk.f32.vlgmr.msra.gmra.mxu0 %vm74_vm0, %v632_v5  ;;  %v810_v7 = vsel %vm74_vm0, %v632_v5, 0.0  ;;  %v725_v9 = vrot.slane %v632_v5, 1  ;;  %p1104_p5 = por %p1103_p4, %p1102_p3 }
 0x352   :  { %1047 = vmatpush3.xpose.msk.msra.mxu0 %vm74_vm0, %v726_v6  ;;  %1048 = vmatprep.mubr.msk.f32.mxu0 %vm1146_vm1, %v1145_v8  ;;  %811 = vst [vmem:[#allocation9] sm:$0x3] %v810_v7 }
 0x353   :  { %p1105_p6 = pnand %p1104_p5, %p1098_p2 }
 0x355   :  { %1049 = vmatmul.mubr.msk.f32.vlgmr.msra.gmra.mxu0 %vm74_vm0, %v725_v9 }
 0x356   :  { %1108 = shalt.err (!%p1105_p6)
}
 0x357   :  { %833 = dma.vmem_to_hbm [thread:$0]  %s831_s9, 32, %s1531_s15, [#allocation10]   ;;  %v805_v13 = vstv %s1529_s13  ;;  %vm807_vm13 = vcmask 23552  }
 0x358   :  { %s1148_s0 = smov [#allocation7]  }
 0x359   :  { %s820_s7 = sshll.u32 %s1148_s0, 4  ;;  %s821_s7 = int_to_ptr.vmem [resolvable:$true] %s820_s7 }
 0x35a   :  { %s1117_s2 = scalar_lea.vmem %s821_s7, 32  ;;  %p1122_p8 = scmp.lt.s32.totalorder %s821_s7, %s821_s7 }
 0x35b   :  { %p1118_p7 = scmp.ne.s32.totalorder %s821_s7, %s1117_s2  ;;  %p1123_p9 = scmp.lt.s32.totalorder %s1117_s2, %s1117_s2 }
 0x35d   :  { %p1124_p10 = por %p1123_p9, %p1122_p8 }
 0x35f   :  { %p1125_p11 = pnand %p1124_p10, %p1118_p7 }
 0x411   :  { %v721_v10 = vpop.f32.mrf.mxu0 }
 0x413   :  { %v1045_v8 = vpop.f32.mrf.mxu0 }
 0x415   :  { %v797_v11 = vpop.f32.mrf.mxu0 }
 0x416   :  { %v802_v12 = vrot.slane %v797_v11, 7 }
 0x417   :  { %v1050_v14 = vpop.f32.mrf.mxu0 }
 0x418   :  { %v804_v15 = vsel %vm183_vm2, %v721_v10, %v802_v12 }
 0x419   :  { %v806_v16 = vmul.f32 %v805_v13, %v804_v15 }
 0x41b   :  { %v808_v17 = vsel %vm807_vm13, %v806_v16, 0.0 }
 0x41c   :  { %809 = vst [vmem:[#allocation7] sm:$0x3] %v808_v17 }
 0x41d   :  { %1128 = shalt.err (!%p1125_p11)
}
 0x41e   :  { %s1539_s13 = sld [smem:[#allocation16_spill]] }
 0x424   :  { %823 = dma.vmem_to_hbm [thread:$0]  %s821_s7, 32, %s1539_s13, [#allocation8]  }
 0x425   :  { %1139 = dma.done.wait [#allocation8], 32  }
 0x426   :  { %1140 = vsyncadd [#allocation8], 4294967264 }
 0x427   :  { %1141 = dma.done.wait [#allocation10], 32  }
 0x428   :  { %1142 = vsyncadd [#allocation10], 4294967264 }
 0x429   :  { %844 = vsyncpa [#allocation8], 1 }
 0x42a   :  { %845 = vsyncpa [#allocation10], 1 }

</bundles_post_ra>
